<compile_context>
chip_gen: v7x
topology: tpu7x:2x2x1
jax: 0.10.0
libtpu: 0.0.40
codegen_flags: <defaults>
</compile_context>

<pallas_src>
import functools

import jax
import jax.numpy as jnp
from jax import lax
from jax.experimental import pallas as pl
from jax.experimental.pallas import tpu as pltpu


def _round_up(x, m):
    return ((x + m - 1) // m) * m


def _vmem_capacity_bytes():
    """Best-effort physical VMEM query; conservative (64 MiB) fallback."""
    try:
        info = pltpu.get_tpu_info()
        cap = getattr(info, "vmem_capacity_bytes", None)
        if cap:
            return int(cap)
    except Exception:
        pass
    return 64 * 1024 * 1024


def _choose_tile_n(n, c, itemsize, vmem_cap_bytes):
    """Batch tile: big DMA bursts, sublane-aligned, capped at ceil(N)."""
    align = {1: 32, 2: 16, 4: 8}.get(itemsize, 8)   # sublane packing of dtype
    # Per-step preds-tile budget in *input dtype* bytes.  Total VMEM use is
    # roughly 2x (double buffering) plus 2 tile-sized temporaries.
    if vmem_cap_bytes >= 96 * 1024 * 1024:          # 128 MiB parts (v5e/v6e)
        budget = 12 * 1024 * 1024
    else:                                           # 64 MiB parts (v7x)
        budget = 8 * 1024 * 1024
    t = budget // max(1, c * itemsize)
    t = max(align, (t // align) * align)
    t = min(t, _round_up(n, align))
    return int(t)


def _label_smoothing_kernel(preds_ref, target_ref, out_ref, *,
                            smoothing, tile_n, tiles_per_slice, n_total):
    # preds_ref:  (TILE_N, C) input dtype, VMEM (pipelined tile)
    # target_ref: (TILE_N, 1) int32, VMEM
    # out_ref:    (1, 1) f32, SMEM -- per-slice partial sum (accumulator)
    c = pl.program_id(0)        # megacore slice (parallel)
    i = pl.program_id(1)        # reduction step within the slice (arbitrary)

    @pl.when(i == 0)
    def _init():
        out_ref[0, 0] = jnp.float32(0.0)

    x = preds_ref[...]                                   # (TN, C), input dtype
    tile_rows, n_cls = x.shape
    ones_c = jnp.ones((n_cls, 1), dtype=x.dtype)
    hi = lax.Precision.HIGHEST                           # full-accuracy MXU passes

    # Row-wise logsumexp; the C-wide sum of exp() runs on the MXU.
    row_max = jnp.max(x, axis=-1, keepdims=True)                     # XLU, (TN,1)
    e = jnp.exp(x - row_max)                                         # EUP, (TN,C)
    denom = jnp.dot(e, ones_c, precision=hi,
                    preferred_element_type=jnp.float32)              # MXU, (TN,1) f32
    z = row_max.astype(jnp.float32) + jnp.log(denom)                 # logsumexp

    # sum_j x_ij and x_i[target_i] -- both C-wide reductions on the MXU.
    row_sum = jnp.dot(x, ones_c, precision=hi,
                      preferred_element_type=jnp.float32)            # (TN,1) f32
    # TODO(synk): out-of-range / negative targets match no column, so the row
    # silently contributes logsumexp (no ignore_index / range check).
    tgt = target_ref[...]                                            # (TN,1) int32
    col_ids = lax.broadcasted_iota(jnp.int32, (1, n_cls), 1)         # (1,C) only
    x_sel = jnp.where(col_ids == tgt, x, jnp.zeros((), x.dtype))     # (TN,C), in-dtype
    x_tgt = jnp.dot(x_sel, ones_c, precision=hi,
                    preferred_element_type=jnp.float32)              # (TN,1) f32

    # Merged per-row loss:
    #   (s/C) * (C*z - row_sum) + (1-s) * (z - x_tgt)
    # = z - (s/C)*row_sum - (1-s)*x_tgt
    base = jnp.float32(smoothing) / jnp.float32(n_cls)
    partial_rows = z - base * row_sum - jnp.float32(1.0 - smoothing) * x_tgt

    # Mask rows past the true batch (ragged last tile and the clamped
    # duplicate tile on the second megacore slice).  Single cheap (TN,1)
    # select; select (not multiply) so garbage-row NaN/Inf cannot leak.
    g = c * tiles_per_slice + i
    row_ids = g * tile_n + lax.broadcasted_iota(jnp.int32, (tile_rows, 1), 0)
    partial_rows = jnp.where(row_ids < n_total, partial_rows, 0.0)

    out_ref[0, 0] += jnp.sum(partial_rows)


def label_smoothing_loss(preds, target, *, smoothing=0.1, reduction="mean",
                         tile_n=None):
    """Pallas TPU implementation of LabelSmoothingLoss.forward (weight=None)."""
    assert 0 <= smoothing < 1
    if reduction not in ("mean", "sum"):
        # TODO(synk): reduction='none' (per-row loss vector) and the per-class
        # `weight` argument of F.nll_loss are not implemented in this kernel.
        raise NotImplementedError(
            "label_smoothing_loss kernel supports reduction='mean' or 'sum' only")

    n, c = preds.shape
    itemsize = jnp.dtype(preds.dtype).itemsize
    vmem_cap = _vmem_capacity_bytes()
    if tile_n is None:
        tile_n = _choose_tile_n(n, c, itemsize, vmem_cap)
    tile_n = int(tile_n)
    num_tiles = int(pl.cdiv(n, tile_n))

    # Megacore: split batch tiles across 2 "parallel" slices (v7x has 2 TCs;
    # on v5e/v6e the second slice just runs serially on the same core).
    num_slices = 2 if num_tiles >= 2 else 1
    tiles_per_slice = int(pl.cdiv(num_tiles, num_slices))
    last_tile = num_tiles - 1

    target2d = target.astype(jnp.int32).reshape(n, 1)

    kernel = functools.partial(
        _label_smoothing_kernel,
        smoothing=float(smoothing),
        tile_n=tile_n,
        tiles_per_slice=tiles_per_slice,
        n_total=int(n),
    )

    def data_map(ci, ti):
        # Clamp so the duplicate tail tile on the second slice stays in
        # bounds; its rows are masked out inside the kernel.
        return (jnp.minimum(ci * tiles_per_slice + ti, last_tile), 0)

    if vmem_cap >= 96 * 1024 * 1024:
        vmem_limit = 100 * 1024 * 1024       # 128 MiB VMEM parts (v5e / v6e)
    else:
        vmem_limit = 48 * 1024 * 1024        # 64 MiB VMEM parts (v7x)

    cost = pl.CostEstimate(
        flops=8 * n * c,
        transcendentals=n * c + n,
        bytes_accessed=n * c * itemsize + n * 4 + num_slices * 4,
    )

    partials = pl.pallas_call(
        kernel,
        out_shape=jax.ShapeDtypeStruct((num_slices, 1), jnp.float32),
        grid_spec=pltpu.PrefetchScalarGridSpec(
            num_scalar_prefetch=0,
            grid=(num_slices, tiles_per_slice),
            in_specs=[
                pl.BlockSpec((tile_n, c), data_map),    # preds tile (pipelined)
                pl.BlockSpec((tile_n, 1), data_map),    # target tile
            ],
            out_specs=pl.BlockSpec((1, 1), lambda ci, ti: (ci, 0),
                                   memory_space=pltpu.SMEM),
        ),
        compiler_params=pltpu.CompilerParams(
            dimension_semantics=("parallel", "arbitrary"),
            vmem_limit_bytes=vmem_limit,
        ),
        cost_estimate=cost,
    )(preds, target2d)

    total = jnp.sum(partials)
    if reduction == "mean":
        total = total / jnp.float32(n)
    return total


def _reference(preds, target, *, smoothing=0.1, reduction="mean"):
    logp = jax.nn.log_softmax(preds.astype(jnp.float32), axis=-1)
    smooth = -jnp.sum(logp, axis=-1)
    nll = -jnp.take_along_axis(logp, target[:, None].astype(jnp.int32), axis=-1)[:, 0]
    if reduction == "mean":
        smooth, nll = smooth.mean(), nll.mean()
    else:
        smooth, nll = smooth.sum(), nll.sum()
    c = preds.shape[-1]
    return smoothing * (smooth / c) + (1 - smoothing) * nll


if __name__ == "__main__":
    kp, kt, kp2, kt2 = jax.random.split(jax.random.PRNGKey(0), 4)

    # Case 1: small (batch, classes) shapes matching the module's convention.
    N, C = 8, 32
    preds = jax.random.normal(kp, (N, C), dtype=jnp.float32)
    target = jax.random.randint(kt, (N,), 0, C, dtype=jnp.int32)

    out = jax.block_until_ready(
        label_smoothing_loss(preds, target, smoothing=0.1, reduction="mean"))
    ref = _reference(preds, target, smoothing=0.1, reduction="mean")
    assert jnp.allclose(out, ref, rtol=1e-4, atol=1e-4), (out, ref)

    # Case 2: even tile split across the two megacore slices + ragged last
    # tile (exercises the per-slice accumulator and row masking).
    N2, C2 = 100, 256
    preds2 = jax.random.normal(kp2, (N2, C2), dtype=jnp.float32)
    target2 = jax.random.randint(kt2, (N2,), 0, C2, dtype=jnp.int32)
    for red in ("mean", "sum"):
        out2 = jax.block_until_ready(
            label_smoothing_loss(preds2, target2, smoothing=0.2, reduction=red,
                                 tile_n=32))
        ref2 = _reference(preds2, target2, smoothing=0.2, reduction=red)
        assert jnp.allclose(out2, ref2, rtol=1e-4, atol=1e-4), (red, out2, ref2)

    # Case 3: odd number of tiles (cdiv(100, 48) = 3) so the second slice hits
    # the clamped-duplicate-tile path; also exercises the ragged tail.
    for red in ("mean", "sum"):
        out3 = jax.block_until_ready(
            label_smoothing_loss(preds2, target2, smoothing=0.1, reduction=red,
                                 tile_n=48))
        ref3 = _reference(preds2, target2, smoothing=0.1, reduction=red)
        assert jnp.allclose(out3, ref3, rtol=1e-4, atol=1e-4), (red, out3, ref3)

    print("KERNEL_OK")
</pallas_src>

<mosaic_0001>
module attributes {stable_mosaic.version = 11 : i64} {
  func.func @_label_smoothing_kernel(%arg0: i32, %arg1: i32, %arg2: memref<8x32xf32, #tpu.memory_space<vmem>>, %arg3: memref<8x1xi32, #tpu.memory_space<vmem>>, %arg4: memref<1x1xf32, #tpu.memory_space<smem>>) attributes {dimension_semantics = [#tpu.dimension_semantics<parallel>, #tpu.dimension_semantics<arbitrary>], iteration_bounds = array<i64: 1, 1>, scalar_prefetch = 0 : i64, scratch_operands = 0 : i64, tpu.core_type = #tpu.core_type<tc>, window_params = [{transform_indices = @transform_0, window_bounds = array<i64: 8, 32>}, {transform_indices = @transform_1, window_bounds = array<i64: 8, 1>}, {transform_indices = @transform_2, window_bounds = array<i64: 1, 1>}]} {
    %c0_i32 = arith.constant 0 : i32
    %0 = arith.cmpi eq, %arg1, %c0_i32 : i32
    %1 = arith.extui %0 : i1 to i32
    %c0_i32_0 = arith.constant 0 : i32
    %2 = arith.cmpi ne, %1, %c0_i32_0 : i32
    scf.if %2 {
      %cst_19 = arith.constant 0.000000e+00 : f32
      %c0_20 = arith.constant 0 : index
      %c0_21 = arith.constant 0 : index
      %46 = memref.load %arg4[%c0_20, %c0_21] : memref<1x1xf32, #tpu.memory_space<smem>>
      memref.store %cst_19, %arg4[%c0_20, %c0_21] : memref<1x1xf32, #tpu.memory_space<smem>>
    } else {
    }
    %c0 = arith.constant 0 : index
    %c0_1 = arith.constant 0 : index
    %3 = vector.load %arg2[%c0, %c0_1] : memref<8x32xf32, #tpu.memory_space<vmem>>, vector<8x32xf32>
    %cst = arith.constant 1.000000e+00 : f32
    %4 = vector.broadcast %cst : f32 to vector<32x1xf32>
    %cst_2 = arith.constant dense<0xFF800000> : vector<8xf32>
    %5 = vector.multi_reduction <maximumf>, %3, %cst_2 [1] : vector<8x32xf32> to vector<8xf32>
    %6 = vector.shape_cast %5 : vector<8xf32> to vector<8x1xf32>
    %7 = vector.broadcast %6 : vector<8x1xf32> to vector<8x32xf32>
    %8 = arith.subf %3, %7 : vector<8x32xf32>
    %9 = math.exp %8 : vector<8x32xf32>
    %cst_3 = arith.constant dense<0.000000e+00> : vector<8x1xf32>
    %10 = tpu.matmul %9, %4, %cst_3 {dimension_numbers = #tpu.dot_dimension_numbers<[1], [0], [0], [1], [0, 0, 1, 1], [], []>, precision = #tpu.contract_precision<fp32>} : vector<8x32xf32>, vector<32x1xf32>, vector<8x1xf32> -> vector<8x1xf32>
    %11 = math.log %10 : vector<8x1xf32>
    %12 = arith.addf %6, %11 : vector<8x1xf32>
    %cst_4 = arith.constant dense<0.000000e+00> : vector<8x1xf32>
    %13 = tpu.matmul %3, %4, %cst_4 {dimension_numbers = #tpu.dot_dimension_numbers<[1], [0], [0], [1], [0, 0, 1, 1], [], []>, precision = #tpu.contract_precision<fp32>} : vector<8x32xf32>, vector<32x1xf32>, vector<8x1xf32> -> vector<8x1xf32>
    %c0_5 = arith.constant 0 : index
    %c0_6 = arith.constant 0 : index
    %14 = vector.load %arg3[%c0_5, %c0_6] : memref<8x1xi32, #tpu.memory_space<vmem>>, vector<8x1xi32>
    %15 = tpu.iota {dimensions = array<i32: 1>} : vector<1x32xi32>
    %16 = vector.broadcast %15 : vector<1x32xi32> to vector<8x32xi32>
    %17 = vector.broadcast %14 : vector<8x1xi32> to vector<8x32xi32>
    %18 = arith.cmpi eq, %16, %17 : vector<8x32xi32>
    %cst_7 = arith.constant 0.000000e+00 : f32
    %19 = vector.broadcast %cst_7 : f32 to vector<8x32xf32>
    %20 = arith.select %18, %3, %19 : vector<8x32xi1>, vector<8x32xf32>
    %cst_8 = arith.constant dense<0.000000e+00> : vector<8x1xf32>
    %21 = tpu.matmul %20, %4, %cst_8 {dimension_numbers = #tpu.dot_dimension_numbers<[1], [0], [0], [1], [0, 0, 1, 1], [], []>, precision = #tpu.contract_precision<fp32>} : vector<8x32xf32>, vector<32x1xf32>, vector<8x1xf32> -> vector<8x1xf32>
    %cst_9 = arith.constant 1.000000e-01 : f32
    %cst_10 = arith.constant 3.200000e+01 : f32
    %22 = arith.divf %cst_9, %cst_10 : f32
    %23 = vector.broadcast %22 : f32 to vector<8x1xf32>
    %24 = arith.mulf %23, %13 : vector<8x1xf32>
    %25 = arith.subf %12, %24 : vector<8x1xf32>
    %cst_11 = arith.constant 0.899999976 : f32
    %26 = vector.broadcast %cst_11 : f32 to vector<8x1xf32>
    %27 = arith.mulf %26, %21 : vector<8x1xf32>
    %28 = arith.subf %25, %27 : vector<8x1xf32>
    %c1_i32 = arith.constant 1 : i32
    %29 = arith.muli %arg0, %c1_i32 : i32
    %30 = arith.addi %29, %arg1 : i32
    %c8_i32 = arith.constant 8 : i32
    %31 = arith.muli %30, %c8_i32 : i32
    %32 = tpu.iota {dimensions = array<i32: 0>} : vector<8x1xi32>
    %33 = vector.broadcast %31 : i32 to vector<8x1xi32>
    %34 = arith.addi %33, %32 : vector<8x1xi32>
    %c8_i32_12 = arith.constant 8 : i32
    %35 = vector.broadcast %c8_i32_12 : i32 to vector<8x1xi32>
    %36 = arith.cmpi slt, %34, %35 : vector<8x1xi32>
    %cst_13 = arith.constant 0.000000e+00 : f32
    %37 = vector.broadcast %cst_13 : f32 to vector<8x1xf32>
    %38 = arith.select %36, %28, %37 : vector<8x1xi1>, vector<8x1xf32>
    %c0_14 = arith.constant 0 : index
    %c0_15 = arith.constant 0 : index
    %39 = memref.load %arg4[%c0_14, %c0_15] : memref<1x1xf32, #tpu.memory_space<smem>>
    %40 = vector.shape_cast %38 : vector<8x1xf32> to vector<1x8x1xf32>
    %cst_16 = arith.constant dense<0.000000e+00> : vector<1xf32>
    %41 = vector.multi_reduction <add>, %40, %cst_16 [1, 2] : vector<1x8x1xf32> to vector<1xf32>
    %42 = vector.shape_cast %41 : vector<1xf32> to vector<1x1x1xf32>
    %43 = vector.extract %42[0, 0, 0] : f32 from vector<1x1x1xf32>
    %44 = arith.addf %39, %43 : f32
    %c0_17 = arith.constant 0 : index
    %c0_18 = arith.constant 0 : index
    %45 = memref.load %arg4[%c0_17, %c0_18] : memref<1x1xf32, #tpu.memory_space<smem>>
    memref.store %44, %arg4[%c0_17, %c0_18] : memref<1x1xf32, #tpu.memory_space<smem>>
    return
  }
  func.func @transform_0(%arg0: i32, %arg1: i32) -> (i32, i32) {
    %c1_i32 = arith.constant 1 : i32
    %0 = arith.muli %arg0, %c1_i32 : i32
    %1 = arith.addi %0, %arg1 : i32
    %c0_i32 = arith.constant 0 : i32
    %2 = arith.minsi %1, %c0_i32 : i32
    %c0_i32_0 = arith.constant 0 : i32
    %c0_i32_1 = arith.constant 0 : i32
    return %2, %c0_i32_0 : i32, i32
  }
  func.func @transform_1(%arg0: i32, %arg1: i32) -> (i32, i32) {
    %c1_i32 = arith.constant 1 : i32
    %0 = arith.muli %arg0, %c1_i32 : i32
    %1 = arith.addi %0, %arg1 : i32
    %c0_i32 = arith.constant 0 : i32
    %2 = arith.minsi %1, %c0_i32 : i32
    %c0_i32_0 = arith.constant 0 : i32
    %c0_i32_1 = arith.constant 0 : i32
    return %2, %c0_i32_0 : i32, i32
  }
  func.func @transform_2(%arg0: i32, %arg1: i32) -> (i32, i32) {
    %c0_i32 = arith.constant 0 : i32
    %c0_i32_0 = arith.constant 0 : i32
    return %arg0, %c0_i32 : i32, i32
  }
}

</mosaic_0001>

<bundles_post_ra>
// kernel: tpu_custom_call.1
= control target key start
LH: loop header
LB: loop body
LE: loop exit
PB: predicated region body
PF: predicated region fallthrough
CT: control target
= control target key end

     0   :  { %vm73_vm0 = vcmask 261120   ;;  %s1901_s0 = inlined_call_operand.vmem [shape: f32[8,32], index: 0, kind: input, shape index: {}]   ;;  %s1902_s1 = inlined_call_operand.vmem [shape: s32[8,1], index: 1, kind: input, shape index: {}]   ;;  %s1903_s2 = inlined_call_operand.hbm [shape: f32[1,1], index: 2, kind: output, shape index: {}]  }
   0x1   :  { %v72_v0 = vld [vmem:[%s1901_s0] sm:$0xff] }
   0x2   :  { %7 = vsyncpa [#allocation3], 0  ;;  %v74_v1 = vsel %vm73_vm0, %v72_v0, -inf  ;;  %v1747_v2 = vmov 0   ;;  %v955_v3 = vld [vmem:[%s1902_s1] sm:$0xff]  ;;  %v1748_v4 = vmov 0.0   ;;  %v956_v10 = vlaneseq }
   0x3   :  { %1730 = vset.pattern.permute.xlu0 %v1747_v2  ;;  %1525 = vmatprep.subr.mxu0 %v1748_v4  ;;  %v1749_v5 = vmov 0.0|0.0   ;;  %vm1750_vm1 = vmmov 0   ;;  %v1751_v6 = vmov 1.0|1.0   ;;  %v520_v17 = vsel %vm73_vm0, %v72_v0, 0  ;;  %s1735_s14 = scalar_lea.hbm %s1903_s2, 16 }
   0x4   :  { %75 = vmax.xlane.f32.xlu0 %v74_v1  ;;  %1658 = vmatprep.subr.bf16.mxu1 %v1749_v5  ;;  %v957_v13 = vand.u32 127, %v956_v10  ;;  %v1796_v19 = vand.u32 4294901760, %v520_v17  ;;  %vm1412_vm3 = vcmask 7168   ;;  %p1736_p0 = scmp.ne.s32.totalorder %s1903_s2, %s1735_s14  ;;  %p1739_p1 = scmp.lt.u32.totalorder %s1735_s14, %s1903_s2 }
   0x5   :  { %1526 = vmatpush3.msra.mxu0 %v1748_v4  ;;  %1527 = vmatprep.mubr.msk.f32.mxu0 %vm1750_vm1, %v1748_v4 }
   0x6   :  { %1659 = vmatpush3.bf16.msra.mxu1 %v1751_v6  ;;  %1530 = vmatprep.subr.mxu0 %v1748_v4  ;;  %v1800_v24 = vsub.f32 %v520_v17, %v1796_v19  ;;  %p1741_p2 = pnand %p1739_p1, %p1736_p0 }
   0x7   :  { %1660 = vmatprep.subr.bf16.mxu1 %v1749_v5  ;;  %1522 = vmatprep.mubr.msk.f32.mxu1 %vm1750_vm1, %v1748_v4 }
   0x8   :  { %v589_v26 = vand.u32 4294901760, %v1800_v24 }
   0xa   :  { %1661 = vmatpush3.bf16.msra.mxu1 %v1751_v6  ;;  %v590_v28 = vsub.f32 %v1800_v24, %v589_v26 }
   0xb   :  { %1662 = vmatprep.subr.bf16.mxu1 %v1749_v5 }
   0xc   :  { %v591_v30 = vand.u32 4294901760, %v590_v28 }
  0x1a   :  { %959 = vperm.xlu0 %1730, %v955_v3  }
  0x91   :  { %v1787_v7 = vpop.xlane.xlu0 %75 }
  0x92   :  { %v77_v8 = vsub.f32 %v72_v0, %v1787_v7 }
  0x94   :  { %v78_v9 = vmul.f32 1.442695, %v77_v8 }
  0x96   :  { %1731 = vpow2.f32 %v78_v9 }
  0x99   :  { %v960_v15 = vpop.permute.xlu0 %959 }
  0x9a   :  { %vm961_vm2 = vcmp.eq.s32.totalorder %v957_v13, %v960_v15 }
  0x9b   :  { %v962_v21 = vsel %vm961_vm2, %v72_v0, 0.0 }
  0x9c   :  { %v964_v23 = vsel %vm73_vm0, %v962_v21, 0 }
  0x9d   :  { %v1804_v25 = vand.u32 4294901760, %v964_v23 }
  0x9f   :  { %v1032_v27 = vsub.f32 %v964_v23, %v1804_v25 }
  0xa0   :  { %v1732_v11 = vpop.eup %1731 }
  0xa1   :  { %v81_v12 = vsel %vm73_vm0, %v1732_v11, 0  ;;  %v1033_v29 = vand.u32 4294901760, %v1032_v27 }
  0xa2   :  { %v148_v14 = vand.u32 4294901760, %v81_v12 }
  0xa3   :  { %v1034_v31 = vsub.f32 %v1032_v27, %v1033_v29 }
  0xa4   :  { %1528 = vmatmul.mubr.f32.vlgmr.msra.gmra.mrb[0].mxu0 %v148_v14  ;;  %v149_v16 = vsub.f32 %v81_v12, %v148_v14 }
  0xa5   :  { %1531 = vmatpush3.msra.mxu0 %v1748_v4  ;;  %1532 = vmatprep.mubr.msk.f32.mxu0 %vm1750_vm1, %v1748_v4  ;;  %v1035_v32 = vand.u32 4294901760, %v1034_v31 }
  0xa6   :  { %v150_v18 = vand.u32 4294901760, %v149_v16  ;;  %1546 = vmatprep.subr.mxu0 %v1748_v4 }
  0xa8   :  { %v151_v20 = vsub.f32 %v149_v16, %v150_v18 }
  0xaa   :  { %v152_v22 = vand.u32 4294901760, %v151_v20 }
  0xac   :  { %1523 = vmatmul.mubr.f32.vlgmr.msra.gmra.mrb[0].mxu1 %v152_v22  ;;  %1533 = vmatmul.mubr.f32.vlgmr.msra.gmra.mrb[0].mxu0 %v149_v16 }
  0xad   :  { %1663 = vmatpush3.bf16.msra.mxu1 %v1751_v6  ;;  %1547 = vmatpush3.msra.mxu0 %v1748_v4 }
  0xae   :  { %1664 = vmatprep.subr.bf16.mxu1 %v1749_v5  ;;  %1548 = vmatprep.mubr.msk.f32.mxu0 %vm1750_vm1, %v1748_v4 }
  0xaf   :  { %1666 = vmatprep.subr.bf16.mxu0 %v1749_v5  ;;  %1543 = vmatprep.mubr.msk.f32.mxu1 %vm1750_vm1, %v1748_v4 }
  0xb0   :  { %1549 = vmatmul.mubr.f32.vlgmr.msra.gmra.mrb[2].mxu0 %v148_v14 }
  0xb1   :  { %1665 = vmatpush3.bf16.msra.mxu1 %v1751_v6  ;;  %1667 = vmatpush3.bf16.msra.mxu0 %v1751_v6 }
  0xb2   :  { %1668 = vmatprep.subr.bf16.mxu0 %v1749_v5  ;;  %1670 = vmatprep.subr.bf16.mxu1 %v1749_v5 }
  0xb3   :  { %1559 = vmatprep.mubr.msk.f32.mxu0 %vm1750_vm1, %v1748_v4 }
  0xb4   :  { %1544 = vmatmul.mubr.f32.vlgmr.msra.gmra.mrb[2].mxu1 %v150_v18 }
  0xb5   :  { %1669 = vmatpush3.bf16.msra.mxu0 %v1751_v6  ;;  %1671 = vmatpush3.bf16.msra.mxu1 %v1751_v6 }
  0xb6   :  { %1672 = vmatprep.subr.bf16.mxu1 %v1749_v5  ;;  %1682 = vmatprep.subr.bf16.mxu0 %v1749_v5 }
  0xb7   :  { %1570 = vmatprep.mubr.msk.f32.mxu1 %vm1750_vm1, %v1748_v4 }
  0xb8   :  { %1560 = vmatmul.mubr.f32.vlgmr.msra.gmra.mrb[2].mxu0 %v148_v14 }
  0xb9   :  { %1673 = vmatpush3.bf16.msra.mxu1 %v1751_v6  ;;  %1683 = vmatpush3.bf16.msra.mxu0 %v1751_v6 }
  0xba   :  { %1684 = vmatprep.subr.bf16.mxu0 %v1749_v5  ;;  %1573 = vmatprep.subr.mxu1 %v1748_v4 }
  0xbb   :  { %1618 = vmatprep.mubr.msk.f32.mxu0 %vm1750_vm1, %v1748_v4 }
  0xbc   :  { %1571 = vmatmul.mubr.f32.vlgmr.msra.gmra.mrb[4].mxu1 %v591_v30 }
  0xbd   :  { %1685 = vmatpush3.bf16.msra.mxu0 %v1751_v6  ;;  %1574 = vmatpush3.msra.mxu1 %v1748_v4 }
  0xbe   :  { %1621 = vmatprep.subr.mxu0 %v1748_v4  ;;  %1575 = vmatprep.mubr.msk.f32.mxu1 %vm1750_vm1, %v1748_v4 }
  0xbf   :  { %1578 = vmatprep.subr.mxu1 %v1748_v4 }
  0xc0   :  { %1619 = vmatmul.mubr.f32.vlgmr.msra.gmra.mrb[4].mxu0 %v1035_v32 }
  0xc1   :  { %1622 = vmatpush3.msra.mxu0 %v1748_v4  ;;  %1623 = vmatprep.mubr.msk.f32.mxu0 %vm1750_vm1, %v1748_v4 }
  0xc2   :  { %1626 = vmatprep.subr.mxu0 %v1748_v4 }
  0xc4   :  { %1576 = vmatmul.mubr.f32.vlgmr.msra.gmra.mrb[4].mxu1 %v1796_v19 }
  0xc5   :  { %1579 = vmatpush3.msra.mxu1 %v1748_v4  ;;  %1580 = vmatprep.mubr.msk.f32.mxu1 %vm1750_vm1, %v1748_v4 }
  0xc6   :  { %1674 = vmatprep.subr.bf16.mxu1 %v1749_v5 }
  0xc8   :  { %1624 = vmatmul.mubr.f32.vlgmr.msra.gmra.mrb[4].mxu0 %v1804_v25 }
  0xc9   :  { %1627 = vmatpush3.msra.mxu0 %v1748_v4  ;;  %1628 = vmatprep.mubr.msk.f32.mxu0 %vm1750_vm1, %v1748_v4 }
  0xca   :  { %1686 = vmatprep.subr.bf16.mxu0 %v1749_v5 }
  0xcc   :  { %1581 = vmatmul.mubr.f32.vlgmr.msra.gmra.mrb[4].mxu1 %v1800_v24 }
  0xcd   :  { %1675 = vmatpush3.bf16.msra.mxu1 %v1751_v6  ;;  %1591 = vmatprep.mubr.msk.f32.mxu1 %vm1750_vm1, %v1748_v4 }
  0xce   :  { %1676 = vmatprep.subr.bf16.mxu1 %v1749_v5 }
  0xd0   :  { %1629 = vmatmul.mubr.f32.vlgmr.msra.gmra.mrb[4].mxu0 %v1032_v27 }
  0xd1   :  { %1677 = vmatpush3.bf16.msra.mxu1 %v1751_v6  ;;  %1687 = vmatpush3.bf16.msra.mxu0 %v1751_v6 }
  0xd2   :  { %1688 = vmatprep.subr.bf16.mxu0 %v1749_v5  ;;  %1594 = vmatprep.subr.mxu1 %v1748_v4 }
  0xd3   :  { %1639 = vmatprep.mubr.msk.f32.mxu0 %vm1750_vm1, %v1748_v4 }
  0xd4   :  { %1592 = vmatmul.mubr.f32.vlgmr.msra.gmra.mrb[4].mxu1 %v589_v26 }
  0xd5   :  { %1689 = vmatpush3.bf16.msra.mxu0 %v1751_v6  ;;  %1595 = vmatpush3.msra.mxu1 %v1748_v4 }
  0xd6   :  { %1642 = vmatprep.subr.mxu0 %v1748_v4  ;;  %1596 = vmatprep.mubr.msk.f32.mxu1 %vm1750_vm1, %v1748_v4 }
  0xd7   :  { %1678 = vmatprep.subr.bf16.mxu1 %v1749_v5 }
  0xd8   :  { %1640 = vmatmul.mubr.f32.vlgmr.msra.gmra.mrb[4].mxu0 %v1033_v29 }
  0xd9   :  { %1643 = vmatpush3.msra.mxu0 %v1748_v4  ;;  %1644 = vmatprep.mubr.msk.f32.mxu0 %vm1750_vm1, %v1748_v4 }
  0xda   :  { %1690 = vmatprep.subr.bf16.mxu0 %v1749_v5 }
  0xdc   :  { %1597 = vmatmul.mubr.f32.vlgmr.msra.gmra.mrb[4].mxu1 %v1796_v19 }
  0xdd   :  { %1679 = vmatpush3.bf16.msra.mxu1 %v1751_v6  ;;  %1607 = vmatprep.mubr.msk.f32.mxu1 %vm1750_vm1, %v1748_v4 }
  0xde   :  { %1680 = vmatprep.subr.bf16.mxu1 %v1749_v5 }
  0xe0   :  { %1645 = vmatmul.mubr.f32.vlgmr.msra.gmra.mrb[4].mxu0 %v1804_v25 }
  0xe1   :  { %1681 = vmatpush3.bf16.msra.mxu1 %v1751_v6  ;;  %1691 = vmatpush3.bf16.msra.mxu0 %v1751_v6 }
  0xe2   :  { %1692 = vmatprep.subr.bf16.mxu0 %v1749_v5  ;;  %1655 = vmatprep.mubr.msk.f32.mxu0 %vm1750_vm1, %v1748_v4 }
  0xe4   :  { %1608 = vmatmul.mubr.f32.vlgmr.msra.gmra.mrb[4].mxu1 %v1796_v19 }
  0xe5   :  { %1693 = vmatpush3.bf16.msra.mxu0 %v1751_v6 }
  0xe8   :  { %1656 = vmatmul.mubr.f32.vlgmr.msra.gmra.mrb[4].mxu0 %v1804_v25 }
 0x17f   :  { %v154_v33 = vpop.f32.mrb[0].mxu1  ;;  %v297_v34 = vpop.f32.mrb[0].mxu0 }
 0x180   :  { %v1694_v35 = vadd.f32 %v297_v34, %v154_v33  ;;  %v1524_v36 = vpop.f32.mrb[1].mxu1  ;;  %v1534_v37 = vpop.f32.mrb[1].mxu0 }
 0x187   :  { %v370_v38 = vpop.f32.mrb[2].mxu1 }
 0x188   :  { %v1695_v39 = vadd.f32 %v1694_v35, %v370_v38  ;;  %v1545_v40 = vpop.f32.mrb[3].mxu1 }
 0x18b   :  { %v512_v41 = vpop.f32.mrb[2].mxu0 }
 0x18c   :  { %v1696_v42 = vadd.f32 %v1695_v39, %v512_v41  ;;  %v1561_v43 = vpop.f32.mrb[3].mxu0 }
 0x18e   :  { %1733 = vlog2.f32 %v1696_v42 }
 0x198   :  { %v1734_v44 = vpop.eup %1733 }
 0x199   :  { %v517_v45 = vmul.f32 0.6931472, %v1734_v44 }
 0x19b   :  { %v518_v47 = vadd.f32 %v517_v45, %v1787_v7 }
 0x1b7   :  { %v951_v46 = vpop.f32.mrb[4].mxu1 }
 0x1b8   :  { %v1399_v48 = vmul.f32 0.003125, %v951_v46  ;;  %v1609_v49 = vpop.f32.mrb[5].mxu1 }
 0x1ba   :  { %v1400_v50 = vsub.f32 %v518_v47, %v1399_v48 }
 0x1bb   :  { %v1395_v51 = vpop.f32.mrb[4].mxu0 }
 0x1bc   :  { %v1401_v52 = vmul.f32 0.9, %v1395_v51  ;;  %v1657_v53 = vpop.f32.mrb[5].mxu0 }
 0x1be   :  { %v1402_v54 = vsub.f32 %v1400_v50, %v1401_v52 }
 0x1c0   :  { %v1413_v55 = vsel %vm1412_vm3, %v1402_v54, 0.0 }
 0x1c1   :  { %1414 = vadd.xlane.f32.xlu1 %v1413_v55 }
 0x24e   :  { %v1415_v56 = vpop.xlane.xlu1 %1414 }
 0x24f   :  { %v1416_v57 = vrot.slane %v1415_v56, 4 }
 0x251   :  { %v1417_v58 = vadd.f32 %v1416_v57, %v1415_v56 }
 0x253   :  { %v1418_v59 = vrot.slane %v1417_v58, 2 }
 0x255   :  { %v1419_v60 = vadd.f32 %v1418_v59, %v1417_v58 }
 0x257   :  { %v1420_v61 = vrot.slane %v1419_v60, 1 }
 0x259   :  { %v1421_v62 = vadd.f32 %v1420_v61, %v1419_v60 }
 0x25b   :  { %1721 = vpush %v1421_v62 }
 0x28c   :  { %s1722_s0 = spop %1721 }
 0x28d   :  { %1425 = sst [smem:[#allocation2]] %s1722_s0 }
 0x28e   :  { %1744 = shalt.err (!%p1741_p2)
}
 0x28f   :  { %s1752_s19 = smov [#allocation2]  }
 0x290   :  { %1433 = dma.smem_to_hbm %s1752_s19, 16, %s1903_s2, [#allocation3]  }
 0x291   :  { %1745 = dma.done.wait [#allocation3], 16  }
 0x292   :  { %1746 = vsyncadd [#allocation3], 4294967280 }
 0x293   :  { %1437 = sfence }
 0x294   :  { %1438 = vsyncpa [#allocation3], 1 }

</bundles_post_ra>
